<compile_context>
chip_gen: v6e
topology: v6e:2x2x1
jax: 0.10.0
libtpu: 0.0.40
codegen_flags: <defaults>
</compile_context>

<pallas_src>
import math

import jax
import jax.numpy as jnp
from jax.experimental import pallas as pl
from jax.experimental.pallas import tpu as pltpu

LANE = 128                       # TPU lane width (padded hidden dims)
OUT_PAD = 8                      # padded output lanes (real outputs = 2)
NEG_SLOPE = 0.01                 # LeakyReLU negative slope
VMEM_BUDGET = 12 * 1024 * 1024   # keep under v5e's 16 MiB default scoped VMEM


def _leaky_relu(x, slope=NEG_SLOPE):
    # max(x, slope*x) == LeakyReLU(x) for 0 < slope < 1 (one vmul + one vmax)
    return jnp.maximum(x, slope * x)


def _round_up(x, m):
    return (x + m - 1) // m * m


def _pad_to(a, shape):
    return jnp.pad(a, [(0, s - d) for d, s in zip(a.shape, shape)])


def _resident_spec(shape):
    # Constant index_map -> DMA'd once, stays VMEM-resident across grid steps.
    # Helper function (not a comprehension lambda) avoids late-binding bugs.
    return pl.BlockSpec(shape, lambda i: (0, 0))


def mlp_kernel(x_ref,
               w1_ref, b1_ref,
               w2_ref, b2_ref,
               w3_ref, b3_ref,
               w4_ref, b4_ref,
               w5_ref, b5_ref,
               o_ref):
    # x_ref: (TB, D) f32; weights bf16 (hidden padded to 128, out to 8 lanes);
    # biases f32; o_ref: (TB, 8) f32.
    x = x_ref[...].astype(jnp.bfloat16)

    h = jnp.dot(x, w1_ref[...], preferred_element_type=jnp.float32) + b1_ref[...]
    h = _leaky_relu(h)
    # dropout(p=0.2) -> identity at inference time
    # TODO(synk): training-mode dropout (random mask via pltpu.prng_*) omitted.

    h = jnp.dot(h.astype(jnp.bfloat16), w2_ref[...],
                preferred_element_type=jnp.float32) + b2_ref[...]
    h = _leaky_relu(h)

    h = jnp.dot(h.astype(jnp.bfloat16), w3_ref[...],
                preferred_element_type=jnp.float32) + b3_ref[...]
    h = _leaky_relu(h)

    h = jnp.dot(h.astype(jnp.bfloat16), w4_ref[...],
                preferred_element_type=jnp.float32) + b4_ref[...]
    h = _leaky_relu(h)

    out = jnp.dot(h.astype(jnp.bfloat16), w5_ref[...],
                  preferred_element_type=jnp.float32) + b5_ref[...]
    o_ref[...] = out.astype(o_ref.dtype)


def sleep_quality_regressor(x, params, *, tb_max=4096):
    """x: (B, D) float32. params: dict of f32 weights/biases. Returns (B, 2)."""
    B, D = x.shape

    # Pad weights once (zero pad rows/cols => real output lanes bit-identical
    # to the unpadded math). Hidden dims -> 128 lanes; final output -> 8 lanes.
    w1 = _pad_to(params["w1"], (D, LANE)).astype(jnp.bfloat16)       # (D, 128)
    b1 = _pad_to(params["b1"], (1, LANE))
    w2 = _pad_to(params["w2"], (LANE, LANE)).astype(jnp.bfloat16)    # (128,128)
    b2 = _pad_to(params["b2"], (1, LANE))
    w3 = _pad_to(params["w3"], (LANE, LANE)).astype(jnp.bfloat16)
    b3 = _pad_to(params["b3"], (1, LANE))
    w4 = _pad_to(params["w4"], (LANE, LANE)).astype(jnp.bfloat16)
    b4 = _pad_to(params["b4"], (1, LANE))
    w5 = _pad_to(params["w5"], (LANE, OUT_PAD)).astype(jnp.bfloat16)  # (128,8)
    b5 = _pad_to(params["b5"], (1, OUT_PAD))
    weights = (w1, b1, w2, b2, w3, b3, w4, b4, w5, b5)
    weight_bytes = sum(w.size * w.dtype.itemsize for w in weights)

    # Batch tile: cap by tb_max and by a VMEM budget (double-buffered x/out
    # tiles + double-buffered weights must fit v5e's 16 MiB default).
    row_bytes = 2 * D * 4 + 2 * OUT_PAD * 4         # per batch-row VMEM bytes
    vmem_cap = max(8, (VMEM_BUDGET - 2 * weight_bytes) // row_bytes // 8 * 8)
    tb_cap = min(tb_max, vmem_cap)

    # cdiv-first grid sizing: padding bounded to < 8 rows per step; force an
    # even number of >=2 steps (when B allows) so v7x megacore shards the
    # batch across both TensorCores.
    num_steps = max(1, math.ceil(B / tb_cap))
    if B >= 16:
        num_steps = max(num_steps, 2)
    if num_steps > 1 and num_steps % 2:
        num_steps += 1
    TB = _round_up(math.ceil(B / num_steps), 8)
    B_pad = TB * num_steps

    # Only the batch dim is (minimally) padded; x stays f32 and is cast to
    # bf16 inside the kernel -- no separate pad/cast HBM pass.
    x_p = x if B_pad == B else _pad_to(x, (B_pad, D))

    grid = (num_steps,)
    in_specs = [pl.BlockSpec((TB, D), lambda i: (i, 0))]
    in_specs += [_resident_spec(w.shape) for w in weights]
    out_specs = pl.BlockSpec((TB, OUT_PAD), lambda i: (i, 0))

    flops = 2 * B_pad * (D * LANE + 3 * LANE * LANE + LANE * OUT_PAD)
    bytes_accessed = (x_p.size * x_p.dtype.itemsize
                      + B_pad * OUT_PAD * 4
                      + weight_bytes)

    out_padded = pl.pallas_call(
        mlp_kernel,
        out_shape=jax.ShapeDtypeStruct((B_pad, OUT_PAD), jnp.float32),
        grid=grid,
        in_specs=in_specs,
        out_specs=out_specs,
        compiler_params=pltpu.CompilerParams(
            dimension_semantics=("parallel",)),
        cost_estimate=pl.CostEstimate(
            flops=flops, transcendentals=0, bytes_accessed=bytes_accessed),
    )(x_p, *weights)

    # 8-lane padded output -> cheap contiguous slice back to (B, 2).
    return out_padded[:B, :2]


def init_params(input_dim, key):
    """Deterministic init matching the nn.Linear layer shapes of the module."""
    dims = [(input_dim, 128), (128, 64), (64, 128), (128, 64), (64, 2)]
    params = {}
    for i, (fan_in, fan_out) in enumerate(dims, start=1):
        key, kw, kb = jax.random.split(key, 3)
        bound = 1.0 / jnp.sqrt(fan_in)
        params[f"w{i}"] = jax.random.uniform(
            kw, (fan_in, fan_out), jnp.float32, -bound, bound)
        params[f"b{i}"] = jax.random.uniform(
            kb, (1, fan_out), jnp.float32, -bound, bound)
    return params


def reference_forward(x, params):
    """Pure-JAX reference mirroring the kernel's bf16-matmul / f32-accumulate."""
    h = x.astype(jnp.bfloat16)
    for i in range(1, 5):
        h = jnp.dot(h, params[f"w{i}"].astype(jnp.bfloat16),
                    preferred_element_type=jnp.float32) + params[f"b{i}"]
        h = _leaky_relu(h)
        h = h.astype(jnp.bfloat16)
    return jnp.dot(h, params["w5"].astype(jnp.bfloat16),
                   preferred_element_type=jnp.float32) + params["b5"]


if __name__ == "__main__":
    key = jax.random.PRNGKey(0)
    B, D = 16, 32
    key, kx = jax.random.split(key)
    x = jax.random.normal(kx, (B, D), jnp.float32)
    params = init_params(D, key)

    out = sleep_quality_regressor(x, params)
    out = jax.block_until_ready(out)

    ref = reference_forward(x, params)
    assert out.shape == (B, 2)
    assert jnp.allclose(out, ref, atol=1e-2, rtol=1e-2), "mismatch vs reference"
    print("KERNEL_OK")
</pallas_src>

<mosaic_0001>
module attributes {stable_mosaic.version = 11 : i64} {
  func.func @mlp_kernel(%arg0: i32, %arg1: memref<8x32xf32, #tpu.memory_space<vmem>>, %arg2: memref<32x128xbf16, #tpu.memory_space<vmem>>, %arg3: memref<1x128xf32, #tpu.memory_space<vmem>>, %arg4: memref<128x128xbf16, #tpu.memory_space<vmem>>, %arg5: memref<1x128xf32, #tpu.memory_space<vmem>>, %arg6: memref<128x128xbf16, #tpu.memory_space<vmem>>, %arg7: memref<1x128xf32, #tpu.memory_space<vmem>>, %arg8: memref<128x128xbf16, #tpu.memory_space<vmem>>, %arg9: memref<1x128xf32, #tpu.memory_space<vmem>>, %arg10: memref<128x8xbf16, #tpu.memory_space<vmem>>, %arg11: memref<1x8xf32, #tpu.memory_space<vmem>>, %arg12: memref<8x8xf32, #tpu.memory_space<vmem>>) attributes {dimension_semantics = [#tpu.dimension_semantics<parallel>], iteration_bounds = array<i64: 2>, scalar_prefetch = 0 : i64, scratch_operands = 0 : i64, tpu.core_type = #tpu.core_type<tc>, window_params = [{transform_indices = @transform_0, window_bounds = array<i64: 8, 32>}, {pipeline_mode = #tpu.pipeline_mode<synchronous>, transform_indices = @transform_1, window_bounds = array<i64: 32, 128>}, {pipeline_mode = #tpu.pipeline_mode<synchronous>, transform_indices = @transform_2, window_bounds = array<i64: 1, 128>}, {pipeline_mode = #tpu.pipeline_mode<synchronous>, transform_indices = @transform_3, window_bounds = array<i64: 128, 128>}, {pipeline_mode = #tpu.pipeline_mode<synchronous>, transform_indices = @transform_4, window_bounds = array<i64: 1, 128>}, {pipeline_mode = #tpu.pipeline_mode<synchronous>, transform_indices = @transform_5, window_bounds = array<i64: 128, 128>}, {pipeline_mode = #tpu.pipeline_mode<synchronous>, transform_indices = @transform_6, window_bounds = array<i64: 1, 128>}, {pipeline_mode = #tpu.pipeline_mode<synchronous>, transform_indices = @transform_7, window_bounds = array<i64: 128, 128>}, {pipeline_mode = #tpu.pipeline_mode<synchronous>, transform_indices = @transform_8, window_bounds = array<i64: 1, 128>}, {pipeline_mode = #tpu.pipeline_mode<synchronous>, transform_indices = @transform_9, window_bounds = array<i64: 128, 8>}, {pipeline_mode = #tpu.pipeline_mode<synchronous>, transform_indices = @transform_10, window_bounds = array<i64: 1, 8>}, {transform_indices = @transform_11, window_bounds = array<i64: 8, 8>}]} {
    %c0 = arith.constant 0 : index
    %c0_0 = arith.constant 0 : index
    %0 = vector.load %arg1[%c0, %c0_0] : memref<8x32xf32, #tpu.memory_space<vmem>>, vector<8x32xf32>
    %1 = arith.truncf %0 : vector<8x32xf32> to vector<8x32xbf16>
    %c0_1 = arith.constant 0 : index
    %c0_2 = arith.constant 0 : index
    %2 = vector.load %arg2[%c0_1, %c0_2] : memref<32x128xbf16, #tpu.memory_space<vmem>>, vector<32x128xbf16>
    %cst = arith.constant dense<0.000000e+00> : vector<8x128xf32>
    %3 = tpu.matmul %1, %2, %cst {dimension_numbers = #tpu.dot_dimension_numbers<[1], [0], [0], [1], [0, 0, 1, 1], [], []>} : vector<8x32xbf16>, vector<32x128xbf16>, vector<8x128xf32> -> vector<8x128xf32>
    %c0_3 = arith.constant 0 : index
    %c0_4 = arith.constant 0 : index
    %4 = vector.load %arg3[%c0_3, %c0_4] : memref<1x128xf32, #tpu.memory_space<vmem>>, vector<1x128xf32>
    %5 = vector.broadcast %4 : vector<1x128xf32> to vector<8x128xf32>
    %6 = arith.addf %3, %5 : vector<8x128xf32>
    %cst_5 = arith.constant 0.00999999977 : f32
    %7 = vector.broadcast %cst_5 : f32 to vector<8x128xf32>
    %8 = arith.mulf %7, %6 : vector<8x128xf32>
    %9 = arith.maximumf %6, %8 : vector<8x128xf32>
    %10 = arith.truncf %9 : vector<8x128xf32> to vector<8x128xbf16>
    %c0_6 = arith.constant 0 : index
    %c0_7 = arith.constant 0 : index
    %11 = vector.load %arg4[%c0_6, %c0_7] : memref<128x128xbf16, #tpu.memory_space<vmem>>, vector<128x128xbf16>
    %cst_8 = arith.constant dense<0.000000e+00> : vector<8x128xf32>
    %12 = tpu.matmul %10, %11, %cst_8 {dimension_numbers = #tpu.dot_dimension_numbers<[1], [0], [0], [1], [0, 0, 1, 1], [], []>} : vector<8x128xbf16>, vector<128x128xbf16>, vector<8x128xf32> -> vector<8x128xf32>
    %c0_9 = arith.constant 0 : index
    %c0_10 = arith.constant 0 : index
    %13 = vector.load %arg5[%c0_9, %c0_10] : memref<1x128xf32, #tpu.memory_space<vmem>>, vector<1x128xf32>
    %14 = vector.broadcast %13 : vector<1x128xf32> to vector<8x128xf32>
    %15 = arith.addf %12, %14 : vector<8x128xf32>
    %cst_11 = arith.constant 0.00999999977 : f32
    %16 = vector.broadcast %cst_11 : f32 to vector<8x128xf32>
    %17 = arith.mulf %16, %15 : vector<8x128xf32>
    %18 = arith.maximumf %15, %17 : vector<8x128xf32>
    %19 = arith.truncf %18 : vector<8x128xf32> to vector<8x128xbf16>
    %c0_12 = arith.constant 0 : index
    %c0_13 = arith.constant 0 : index
    %20 = vector.load %arg6[%c0_12, %c0_13] : memref<128x128xbf16, #tpu.memory_space<vmem>>, vector<128x128xbf16>
    %cst_14 = arith.constant dense<0.000000e+00> : vector<8x128xf32>
    %21 = tpu.matmul %19, %20, %cst_14 {dimension_numbers = #tpu.dot_dimension_numbers<[1], [0], [0], [1], [0, 0, 1, 1], [], []>} : vector<8x128xbf16>, vector<128x128xbf16>, vector<8x128xf32> -> vector<8x128xf32>
    %c0_15 = arith.constant 0 : index
    %c0_16 = arith.constant 0 : index
    %22 = vector.load %arg7[%c0_15, %c0_16] : memref<1x128xf32, #tpu.memory_space<vmem>>, vector<1x128xf32>
    %23 = vector.broadcast %22 : vector<1x128xf32> to vector<8x128xf32>
    %24 = arith.addf %21, %23 : vector<8x128xf32>
    %cst_17 = arith.constant 0.00999999977 : f32
    %25 = vector.broadcast %cst_17 : f32 to vector<8x128xf32>
    %26 = arith.mulf %25, %24 : vector<8x128xf32>
    %27 = arith.maximumf %24, %26 : vector<8x128xf32>
    %28 = arith.truncf %27 : vector<8x128xf32> to vector<8x128xbf16>
    %c0_18 = arith.constant 0 : index
    %c0_19 = arith.constant 0 : index
    %29 = vector.load %arg8[%c0_18, %c0_19] : memref<128x128xbf16, #tpu.memory_space<vmem>>, vector<128x128xbf16>
    %cst_20 = arith.constant dense<0.000000e+00> : vector<8x128xf32>
    %30 = tpu.matmul %28, %29, %cst_20 {dimension_numbers = #tpu.dot_dimension_numbers<[1], [0], [0], [1], [0, 0, 1, 1], [], []>} : vector<8x128xbf16>, vector<128x128xbf16>, vector<8x128xf32> -> vector<8x128xf32>
    %c0_21 = arith.constant 0 : index
    %c0_22 = arith.constant 0 : index
    %31 = vector.load %arg9[%c0_21, %c0_22] : memref<1x128xf32, #tpu.memory_space<vmem>>, vector<1x128xf32>
    %32 = vector.broadcast %31 : vector<1x128xf32> to vector<8x128xf32>
    %33 = arith.addf %30, %32 : vector<8x128xf32>
    %cst_23 = arith.constant 0.00999999977 : f32
    %34 = vector.broadcast %cst_23 : f32 to vector<8x128xf32>
    %35 = arith.mulf %34, %33 : vector<8x128xf32>
    %36 = arith.maximumf %33, %35 : vector<8x128xf32>
    %37 = arith.truncf %36 : vector<8x128xf32> to vector<8x128xbf16>
    %c0_24 = arith.constant 0 : index
    %c0_25 = arith.constant 0 : index
    %38 = vector.load %arg10[%c0_24, %c0_25] : memref<128x8xbf16, #tpu.memory_space<vmem>>, vector<128x8xbf16>
    %cst_26 = arith.constant dense<0.000000e+00> : vector<8x8xf32>
    %39 = tpu.matmul %37, %38, %cst_26 {dimension_numbers = #tpu.dot_dimension_numbers<[1], [0], [0], [1], [0, 0, 1, 1], [], []>} : vector<8x128xbf16>, vector<128x8xbf16>, vector<8x8xf32> -> vector<8x8xf32>
    %c0_27 = arith.constant 0 : index
    %c0_28 = arith.constant 0 : index
    %40 = vector.load %arg11[%c0_27, %c0_28] : memref<1x8xf32, #tpu.memory_space<vmem>>, vector<1x8xf32>
    %41 = vector.broadcast %40 : vector<1x8xf32> to vector<8x8xf32>
    %42 = arith.addf %39, %41 : vector<8x8xf32>
    %c0_29 = arith.constant 0 : index
    %c0_30 = arith.constant 0 : index
    %43 = vector.load %arg12[%c0_29, %c0_30] : memref<8x8xf32, #tpu.memory_space<vmem>>, vector<8x8xf32>
    tpu.vector_store %arg12[%c0_29, %c0_30], %42 {strides = array<i32>} : memref<8x8xf32, #tpu.memory_space<vmem>>, vector<8x8xf32>,
    return
  }
  func.func @transform_0(%arg0: i32) -> (i32, i32) {
    %c0_i32 = arith.constant 0 : i32
    %c0_i32_0 = arith.constant 0 : i32
    return %arg0, %c0_i32 : i32, i32
  }
  func.func @transform_1(%arg0: i32) -> (i32, i32) {
    %c0_i32 = arith.constant 0 : i32
    %c0_i32_0 = arith.constant 0 : i32
    %c0_i32_1 = arith.constant 0 : i32
    return %c0_i32, %c0_i32_0 : i32, i32
  }
  func.func @transform_2(%arg0: i32) -> (i32, i32) {
    %c0_i32 = arith.constant 0 : i32
    %c0_i32_0 = arith.constant 0 : i32
    %c0_i32_1 = arith.constant 0 : i32
    return %c0_i32, %c0_i32_0 : i32, i32
  }
  func.func @transform_3(%arg0: i32) -> (i32, i32) {
    %c0_i32 = arith.constant 0 : i32
    %c0_i32_0 = arith.constant 0 : i32
    %c0_i32_1 = arith.constant 0 : i32
    return %c0_i32, %c0_i32_0 : i32, i32
  }
  func.func @transform_4(%arg0: i32) -> (i32, i32) {
    %c0_i32 = arith.constant 0 : i32
    %c0_i32_0 = arith.constant 0 : i32
    %c0_i32_1 = arith.constant 0 : i32
    return %c0_i32, %c0_i32_0 : i32, i32
  }
  func.func @transform_5(%arg0: i32) -> (i32, i32) {
    %c0_i32 = arith.constant 0 : i32
    %c0_i32_0 = arith.constant 0 : i32
    %c0_i32_1 = arith.constant 0 : i32
    return %c0_i32, %c0_i32_0 : i32, i32
  }
  func.func @transform_6(%arg0: i32) -> (i32, i32) {
    %c0_i32 = arith.constant 0 : i32
    %c0_i32_0 = arith.constant 0 : i32
    %c0_i32_1 = arith.constant 0 : i32
    return %c0_i32, %c0_i32_0 : i32, i32
  }
  func.func @transform_7(%arg0: i32) -> (i32, i32) {
    %c0_i32 = arith.constant 0 : i32
    %c0_i32_0 = arith.constant 0 : i32
    %c0_i32_1 = arith.constant 0 : i32
    return %c0_i32, %c0_i32_0 : i32, i32
  }
  func.func @transform_8(%arg0: i32) -> (i32, i32) {
    %c0_i32 = arith.constant 0 : i32
    %c0_i32_0 = arith.constant 0 : i32
    %c0_i32_1 = arith.constant 0 : i32
    return %c0_i32, %c0_i32_0 : i32, i32
  }
  func.func @transform_9(%arg0: i32) -> (i32, i32) {
    %c0_i32 = arith.constant 0 : i32
    %c0_i32_0 = arith.constant 0 : i32
    %c0_i32_1 = arith.constant 0 : i32
    return %c0_i32, %c0_i32_0 : i32, i32
  }
  func.func @transform_10(%arg0: i32) -> (i32, i32) {
    %c0_i32 = arith.constant 0 : i32
    %c0_i32_0 = arith.constant 0 : i32
    %c0_i32_1 = arith.constant 0 : i32
    return %c0_i32, %c0_i32_0 : i32, i32
  }
  func.func @transform_11(%arg0: i32) -> (i32, i32) {
    %c0_i32 = arith.constant 0 : i32
    %c0_i32_0 = arith.constant 0 : i32
    return %arg0, %c0_i32 : i32, i32
  }
}

</mosaic_0001>

<bundles_post_ra>
// kernel: tpu_custom_call.1
= control target key start
LH: loop header
LB: loop body
LE: loop exit
PB: predicated region body
PF: predicated region fallthrough
CT: control target
= control target key end

     0   :  { %s1824_s0 = inlined_call_operand.hbm [shape: f32[16,32], index: 0, kind: input, shape index: {}]   ;;  %s1825_s1 = inlined_call_operand.hbm [shape: bf16[32,128], index: 1, kind: input, shape index: {}]   ;;  %s1826_s2 = inlined_call_operand.vmem [shape: f32[1,128], index: 2, kind: input, shape index: {}]   ;;  %s1827_s3 = inlined_call_operand.vmem [shape: bf16[128,128], index: 3, kind: input, shape index: {}]   ;;  %s1828_s4 = inlined_call_operand.vmem [shape: f32[1,128], index: 4, kind: input, shape index: {}]   ;;  %s1829_s5 = inlined_call_operand.hbm [shape: bf16[128,128], index: 5, kind: input, shape index: {}]   ;;  %s1830_s6 = inlined_call_operand.vmem [shape: f32[1,128], index: 6, kind: input, shape index: {}]   ;;  %s1831_s7 = inlined_call_operand.hbm [shape: bf16[128,128], index: 7, kind: input, shape index: {}]   ;;  %s1832_s8 = inlined_call_operand.vmem [shape: f32[1,128], index: 8, kind: input, shape index: {}]   ;;  %s1833_s9 = inlined_call_operand.vmem [shape: bf16[128,8], index: 9, kind: input, shape index: {}]   ;;  %s1834_s10 = inlined_call_operand.vmem [shape: f32[1,8], index: 10, kind: input, shape index: {}]   ;;  %s1835_s11 = inlined_call_operand.vmem [shape: f32[16,8], index: 11, kind: output, shape index: {}]  }
   0x1   :  { %1839 = sst [smem:[#allocation12_spill]] %s1825_s1 }
   0x2   :  { %1840 = sst [smem:[#allocation13_spill]] %s1829_s5 }
   0x3   :  { %16 = vsyncpa [#allocation3], 0 }
   0x4   :  { %18 = vsyncpa [#allocation3 + $0x1], 0 }
   0x5   :  { %19 = vsyncpa [#allocation5], 0 }
   0x6   :  { %20 = vsyncpa [#allocation8], 0  ;;  %s1577_s17 = smov 0   ;;  %s1579_s18 = smov 0  }
   0x7   :  { %s1581_s19 = smov 0   ;;  %s1583_s20 = smov 0  }
   0x8 LB: > { %s1596_s21 = sadd.s32 4294967295, %s1507_s20   ;;  %p46_p0 = scmp.ne.s32.totalorder %s1499_s18, %s1495_s17  ;;  %s1507_s20 = sphi %s1583_s20, %s1856_s20   ;;  %s1503_s19 = sphi %s1581_s19, %s1855_s19   ;;  %s1499_s18 = sphi %s1579_s18, %s1854_s18   ;;  %s1495_s17 = sphi %s1577_s17, %s1853_s17  }
   0x9   : > { %p1836_p1 = scmp.eq.s32.totalorder %s1596_s21, 0  ;;  %p1069_p2 = scmp.ge.s32.totalorder %s1507_s20, 1 }
   0xa   : > { %p293_p3 = scmp.lt.s32.totalorder %s1507_s20, 3  ;;  %s1509_s24 = smov [#allocation4]  }
   0xb   : > { %p1604_p4 = por %p1836_p1, %p46_p0  ;;  %s305_s25 = sshll.u32 %s1509_s24, 4  ;;  %s306_s25 = int_to_ptr.vmem [resolvable:$true] %s305_s25 }
   0xc   : > { %p1608_p5 = pnand %p1069_p2, %p293_p3  ;;  %s1510_s27 = smov [#allocation6]  }
   0xd   : > { %s1841_s22 = scalar_select %p1604_p4, 1, 0 }
   0xe   : > { %s1842_s23 = scalar_select %p1608_p5, 1, 0 }
   0xf   : > { %p1265_p6 = pneg %p1608_p5  ;;  %s327_s28 = sshll.u32 %s1510_s27, 4  ;;  %s328_s28 = int_to_ptr.vmem [resolvable:$true] %s327_s28 }
  0x10   : > { %s1511_s29 = smov [#allocation7]   ;;  %s1370_s12 = scalar_lea.vmem %s306_s25, 256 }
  0x11   : > { %p1616_p7 = pnand %p1265_p6, %p1836_p1  ;;  %s343_s30 = sshll.u32 %s1511_s29, 4  ;;  %s344_s30 = int_to_ptr.vmem [resolvable:$true] %s343_s30 }
  0x12   : > { %p1371_p9 = scmp.ne.s32.totalorder %s306_s25, %s1370_s12  ;;  %p1378_p12 = scmp.lt.s32.totalorder %s306_s25, %s306_s25 }
  0x13   : > { %p1361_p8 = pneg %p1616_p7  ;;  %p1379_p13 = scmp.lt.s32.totalorder %s1370_s12, %s1370_s12 }
  0x15   : > { %p1373_p10 = pnand %p1371_p9, %p1361_p8  ;;  %p1380_p0 = por %p1379_p13, %p1378_p12 }
  0x17   : > { %p1374_p11 = pneg %p1373_p10 }
  0x19   : > { %p1381_p2 = pnand %p1380_p0, %p1374_p11 }
  0x1b   : > { %1384 = shalt.err (!%p1381_p2)
}
  0x1c   : > { %s1512_s13 = smov 64   ;;  %s1513_s14 = smov 4  }
  0x1d   : > { %s1844_s1 = sld [smem:[#allocation12_spill]]  ;;  %s1396_s17 = scalar_lea.vmem %s328_s28, 1024 }
  0x1e   : > { %p1397_p3 = scmp.ne.s32.totalorder %s328_s28, %s1396_s17  ;;  %p1404_p10 = scmp.lt.s32.totalorder %s328_s28, %s328_s28 }
  0x1f   : > { %p1405_p1 = scmp.lt.s32.totalorder %s1396_s17, %s1396_s17 }
  0x20   : > { %p1399_p6 = pnand %p1397_p3, %p1361_p8 }
  0x21   : > { %p1406_p12 = por %p1405_p1, %p1404_p10 }
  0x22   : > { %p1400_p9 = pneg %p1399_p6 }
  0x23   : > { %1268 = dma.hbm_to_vmem [thread:$0]  (!%p1616_p7), %s1844_s1, 256, %s306_s25, [#allocation5], %s1512_s13, %s1512_s13, %s1513_s14  }
  0x24   : > { %p1407_p11 = pnand %p1406_p12, %p1400_p9 }
  0x26   : > { %1410 = shalt.err (!%p1407_p11)
}
  0x27   : > { %s1845_s5 = sld [smem:[#allocation13_spill]]  ;;  %s1422_s25 = scalar_lea.vmem %s344_s30, 1024 }
  0x28   : > { %p1423_p13 = scmp.ne.s32.totalorder %s344_s30, %s1422_s25  ;;  %p1430_p3 = scmp.lt.s32.totalorder %s344_s30, %s344_s30 }
  0x29   : > { %p1431_p6 = scmp.lt.s32.totalorder %s1422_s25, %s1422_s25 }
  0x2a   : > { %p1425_p0 = pnand %p1423_p13, %p1361_p8 }
  0x2b   : > { %p1432_p4 = por %p1431_p6, %p1430_p3 }
  0x2c   : > { %p1426_p2 = pneg %p1425_p0 }
  0x2d   : > { %1271 = dma.hbm_to_vmem [thread:$0]  (!%p1616_p7), %s1845_s5, 1024, %s328_s28, [#allocation5], %s1512_s13, %s1512_s13, %s1513_s14  }
  0x2e   : > { %p1433_p1 = pnand %p1432_p4, %p1426_p2 }
  0x30   : > { %1436 = shalt.err (!%p1433_p1)
}
  0x31   : > { %1274 = dma.hbm_to_vmem [thread:$0]  (!%p1616_p7), %s1831_s7, 1024, %s344_s30, [#allocation8], %s1512_s13, %s1512_s13, %s1513_s14  }
  0x32   : > { %s1647_s28 = sadd.s32 1, %s1507_s20   ;;  %s33_s16 = sadd.s32 1, %s1503_s19 }
  0x33   : > { %s30_s15 = ssub.s32 %s1507_s20, %s1647_s28  ;;  %p40_p8 = scmp.ne.s32.totalorder %s1503_s19, %s1499_s18 }
  0x34   : > { %p31_p4 = scmp.eq.s32.totalorder %s30_s15, 0  ;;  %p41_p9 = scmp.eq.s32.totalorder %s1507_s20, 0 }
  0x35   : > { %p1282_p10 = scmp.lt.s32.totalorder %s1507_s20, 2  ;;  %s366_s17 = sand.u32 1, %s1503_s19  }
  0x36   : > { %s1657_s26 = scalar_select %p31_p4, %s1503_s19, %s33_s16  }
  0x37   : > { %p42_p12 = por %p41_p9, %p40_p8  ;;  %s1074_s24 = sshll.u32 %s366_s17, 3 }
  0x38   : > { %s1075_s27 = sshll.u32 %s1507_s20, 7  ;;  %s370_s30 = scalar_lea.vmem [#allocation2], %s1074_s24 }
  0x39   : > { %s1664_s12 = scalar_lea.hbm %s1824_s0, %s1075_s27  ;;  %s377_s13 = sshll.u32 %s370_s30, 4  ;;  %s378_s13 = int_to_ptr.vmem [resolvable:$true] %s377_s13 }
  0x3a   : > { %p1666_p7 = pnand %p1282_p10, %p42_p12  ;;  %s367_s15 = scalar_lea.sflag [#allocation3], %s366_s17 }
  0x3b   : > { %s1437_s16 = scalar_lea.hbm %s1664_s12, 128  ;;  %s1442_s25 = scalar_lea.hbm %s1824_s0, 256 }
  0x3c   : > { %p1438_p11 = scmp.ne.s32.totalorder %s1664_s12, %s1437_s16  ;;  %p1439_p13 = pneg %p1666_p7 }
  0x3d   : > { %p1443_p3 = scmp.lt.s32.totalorder %s1664_s12, %s1824_s0  ;;  %p1444_p6 = scmp.lt.s32.totalorder %s1442_s25, %s1437_s16 }
  0x3e   : > { %p1440_p0 = pnand %p1439_p13, %p1438_p11 }
  0x3f   : > { %p1445_p1 = por %p1444_p6, %p1443_p3 }
  0x40   : > { %p1441_p2 = pneg %p1440_p0 }
  0x42   : > { %p1446_p4 = pnand %p1445_p1, %p1441_p2 }
  0x44   : > { %1449 = shalt.err (!%p1446_p4)
}
  0x45   : > { %s1450_s30 = scalar_lea.vmem %s378_s13, 128  ;;  %s1514_s17 = smov [#allocation2]  }
  0x46   : > { %p1451_p8 = scmp.ne.s32.totalorder %s378_s13, %s1450_s30  ;;  %s1455_s1 = sshll.u32 %s1514_s17, 4  ;;  %s1456_s1 = int_to_ptr.vmem [resolvable:$false] %s1455_s1 }
  0x47   : > { %s1457_s5 = scalar_lea.vmem %s1456_s1, 256  ;;  %p1458_p12 = scmp.lt.s32.totalorder %s378_s13, %s1456_s1 }
  0x48   : > { %p1453_p9 = pnand %p1451_p8, %p1439_p13  ;;  %p1459_p11 = scmp.lt.s32.totalorder %s1457_s5, %s1450_s30 }
  0x4a   : > { %p1454_p10 = pneg %p1453_p9  ;;  %p1460_p0 = por %p1459_p11, %p1458_p12 }
  0x4c   : > { %p1461_p5 = pnand %p1460_p0, %p1454_p10 }
  0x4e   : > { %1464 = shalt.err (!%p1461_p5)
}
  0x4f   : > { %1278 = dma.hbm_to_vmem [thread:$0]  (!%p1666_p7), %s1664_s12, 128, %s378_s13, %s367_s15  }
  0x50   : > { %p1847_p2 = scmp.ne.s32.totalorder %s1842_s23, 0 }
  0x51   : > { %s388_s16 = sand.u32 (!%p1847_p2), 1, %s1499_s18   ;;  %p1848_p13 = scmp.ne.s32.totalorder (!%p1847_p2), %s1841_s22, 0 }
  0x52   : > { %386 = sbr.rel (%p1847_p2) target bundleno = 1108 (0x454), region = 64  ;;  %s1077_s20 = sshll.u32 (!%p1847_p2), %s388_s16, 3 }
  0x53   : > { %s389_s27 = scalar_lea.sflag (!%p1847_p2), [#allocation3], %s388_s16  ;;  %s392_s25 = scalar_lea.vmem (!%p1847_p2), [#allocation2], %s1077_s20 }
  0x57   : > { %1482 = dma.done.wait (%p1848_p13), %s389_s27, 128  }
  0x58   : > { %1484 = vsyncadd (%p1848_p13), %s389_s27, 4294967168  ;;  %p1849_p5 = scmp.eq.s32.totalorder %s1596_s21, 0 }
  0x5a   : > { %1486 = dma.done.wait (%p1849_p5), [#allocation5], 1280   ;;  %p1850_p3 = pmov %p1849_p5 }
  0x5c   : > { %1488 = vsyncadd (%p1850_p3), [#allocation5], 4294966016  ;;  %p1851_p7 = pmov %p1850_p3 }
  0x5d   : > { %p1852_p6 = pmov %p1850_p3 }
  0x5e   : > { %1490 = dma.done.wait (%p1851_p7), [#allocation8], 1024  }
  0x5f   : > { %1492 = vsyncadd (%p1852_p6), [#allocation8], 4294966272  ;;  %v1515_v0 = vmov 0.0   ;;  %vm1516_vm0 = vmmov 0   ;;  %v1325_v1 = vld [vmem:[#allocation4 + $0x8] sm:$0xff]   ;;  %v1326_v2 = vld [vmem:[#allocation4] sm:$0xff]  }
  0x60   : > { %1163 = vmatprep.subr.bf16.mxu0 %v1515_v0  ;;  %1167 = vmatprep.mubr.msk.bf16.mxu0 %vm1516_vm0, %v1515_v0  ;;  %v447_v3 = vld [vmem:[%s392_s25] sm:$0xff]  ;;  %v1327_v4 = vld [vmem:[%s1827_s3 + $0x38] sm:$0xff]   ;;  %v1328_v6 = vld [vmem:[%s1827_s3 + $0x30] sm:$0xff]   ;;  %vm472_vm1 = vcmask 261120   ;;  %p442_p1 = scmp.lt.s32.totalorder %s1596_s21, 1  ;;  %vm972_vm2 = vcmask 64512  }
  0x61   : > { %1171 = vmatprep.subr.bf16.mxu1 %v1515_v0  ;;  %1187 = vmatprep.mubr.msk.bf16.mxu1 %vm1516_vm0, %v1515_v0  ;;  %v448_v5 = vpack.c.bf16 %v447_v3, %v447_v3  ;;  %v1329_v7 = vld [vmem:[%s1827_s3 + $0x28] sm:$0xff]   ;;  %v1330_v8 = vld [vmem:[%s1827_s3 + $0x20] sm:$0xff]   ;;  %v1331_v9 = vld [vmem:[%s1827_s3 + $0x18] sm:$0xff]  }
  0x62   : > { %1164 = vmatpush3.bf16.msra.mxu0 %v1325_v1  ;;  %1172 = vmatpush3.bf16.msra.mxu1 %v1327_v4  ;;  %v1332_v10 = vld [vmem:[%s1827_s3 + $0x10] sm:$0xff]   ;;  %v1333_v11 = vld [vmem:[%s1827_s3 + $0x8] sm:$0xff]   ;;  %v1334_v12 = vld [vmem:[%s1827_s3] sm:$0xff]   ;;  %s1858_s21 = smov (!%p442_p1, %s1596_s21), 1 }
  0x63   : > { %1165 = vmatprep.subr.bf16.mxu0 %v1515_v0  ;;  %1173 = vmatprep.subr.bf16.mxu1 %v1515_v0  ;;  %v1335_v13 = vld [vmem:[#allocation6 + $0x38] sm:$0xff]   ;;  %v1336_v14 = vld [vmem:[#allocation6 + $0x30] sm:$0xff]   ;;  %v1337_v15 = vld [vmem:[#allocation6 + $0x28] sm:$0xff]   ;;  %s1081_s29 = sshll.u32 %s1858_s21, 3 }
  0x64   : > { %v1338_v16 = vld [vmem:[#allocation6 + $0x20] sm:$0xff]   ;;  %v1339_v17 = vld [vmem:[#allocation6 + $0x18] sm:$0xff]   ;;  %v1340_v18 = vld [vmem:[#allocation6 + $0x10] sm:$0xff]   ;;  %s445_s20 = scalar_lea.vmem %s1835_s11, %s1081_s29 }
  0x65   : > { %v1082_v19 = vld [vmem:[%s1826_s2] ss:$0 sm:$0xff]  ;;  %v1341_v28 = vld [vmem:[#allocation6 + $0x8] sm:$0xff]   ;;  %v1343_v30 = vld [vmem:[#allocation7 + $0x38] sm:$0xff]  }
  0x66   : > { %1166 = vmatpush3.bf16.msra.mxu0 %v1326_v2  ;;  %1174 = vmatpush3.bf16.msra.mxu1 %v1328_v6  ;;  %v1342_v29 = vld [vmem:[#allocation6] sm:$0xff]   ;;  %v1344_v31 = vld [vmem:[#allocation7 + $0x30] sm:$0xff]   ;;  %v1345_v32 = vld [vmem:[#allocation7 + $0x28] sm:$0xff]  }
  0x67   : > { %1191 = vmatprep.subr.bf16.mxu0 %v1515_v0  ;;  %1175 = vmatprep.subr.bf16.mxu1 %v1515_v0  ;;  %v1346_v33 = vld [vmem:[#allocation7 + $0x20] sm:$0xff]   ;;  %v1347_v34 = vld [vmem:[#allocation7 + $0x18] sm:$0xff]   ;;  %v1348_v35 = vld [vmem:[#allocation7 + $0x10] sm:$0xff]  }
  0x68   : > { %v1086_v36 = vld [vmem:[%s1828_s4] ss:$0 sm:$0xff]  ;;  %v1349_v45 = vld [vmem:[#allocation7 + $0x8] sm:$0xff]   ;;  %v1351_v47 = vld [vmem:[%s1833_s9 + $0x38] sm:$0xff]  }
  0x69   : > { %1168 = vmatmul.mubr.msk.bf16.vlgmr.msra.gmra.mxu0 %vm472_vm1, %v448_v5  ;;  %v1350_v46 = vld [vmem:[#allocation7] sm:$0xff]   ;;  %v1352_v48 = vld [vmem:[%s1833_s9 + $0x30] sm:$0xff]   ;;  %v1353_v49 = vld [vmem:[%s1833_s9 + $0x28] sm:$0xff]  }
  0x6a   : > { %1207 = vmatprep.mubr.msk.bf16.mxu0 %vm1516_vm0, %v1515_v0  ;;  %1176 = vmatpush3.bf16.msra.mxu1 %v1329_v7  ;;  %v1354_v50 = vld [vmem:[%s1833_s9 + $0x20] sm:$0xff]   ;;  %v1355_v51 = vld [vmem:[%s1833_s9 + $0x18] sm:$0xff]   ;;  %v1356_v52 = vld [vmem:[%s1833_s9 + $0x10] sm:$0xff]  }
  0x6b   : > { %1177 = vmatprep.subr.bf16.mxu1 %v1515_v0  ;;  %1192 = vmatpush3.bf16.msra.mxu0 %v1335_v13  ;;  %v1095_v53 = vld [vmem:[%s1830_s6] ss:$0 sm:$0xff]  ;;  %v1357_v62 = vld [vmem:[%s1833_s9 + $0x8] sm:$0xff]  }
  0x6c   : > { %1193 = vmatprep.subr.bf16.mxu0 %v1515_v0  ;;  %v1358_v63 = vld [vmem:[%s1833_s9] sm:$0xff]  }
  0x6d   : > { %v1104_v1 = vld [vmem:[%s1832_s8] ss:$0 sm:$0xff] }
  0x6e   : > { %1178 = vmatpush3.bf16.msra.mxu1 %v1330_v8 }
  0x6f   : > { %1179 = vmatprep.subr.bf16.mxu1 %v1515_v0  ;;  %1194 = vmatpush3.bf16.msra.mxu0 %v1336_v14 }
  0x70   : > { %1195 = vmatprep.subr.bf16.mxu0 %v1515_v0 }
  0x72   : > { %1180 = vmatpush3.bf16.msra.mxu1 %v1331_v9 }
  0x73   : > { %1181 = vmatprep.subr.bf16.mxu1 %v1515_v0  ;;  %1196 = vmatpush3.bf16.msra.mxu0 %v1337_v15 }
  0x74   : > { %1197 = vmatprep.subr.bf16.mxu0 %v1515_v0 }
  0x76   : > { %1182 = vmatpush3.bf16.msra.mxu1 %v1332_v10 }
  0x77   : > { %1183 = vmatprep.subr.bf16.mxu1 %v1515_v0  ;;  %1198 = vmatpush3.bf16.msra.mxu0 %v1338_v16 }
  0x78   : > { %1199 = vmatprep.subr.bf16.mxu0 %v1515_v0 }
  0x7a   : > { %1184 = vmatpush3.bf16.msra.mxu1 %v1333_v11 }
  0x7b   : > { %1185 = vmatprep.subr.bf16.mxu1 %v1515_v0  ;;  %1200 = vmatpush3.bf16.msra.mxu0 %v1339_v17 }
  0x7c   : > { %1201 = vmatprep.subr.bf16.mxu0 %v1515_v0 }
  0x7e   : > { %1186 = vmatpush3.bf16.msra.mxu1 %v1334_v12 }
  0x7f   : > { %1211 = vmatprep.subr.bf16.mxu1 %v1515_v0  ;;  %1202 = vmatpush3.bf16.msra.mxu0 %v1340_v18 }
  0x80   : > { %1203 = vmatprep.subr.bf16.mxu0 %v1515_v0 }
  0x83   : > { %1204 = vmatpush3.bf16.msra.mxu0 %v1341_v28 }
  0x84   : > { %1205 = vmatprep.subr.bf16.mxu0 %v1515_v0 }
  0x87   : > { %1206 = vmatpush3.bf16.msra.mxu0 %v1342_v29 }
  0x88   : > { %1231 = vmatprep.subr.bf16.mxu0 %v1515_v0 }
 0x129   : > { %v510_v20 = vpop.f32.mrf.mxu0 }
 0x12a   : > { %v511_v21 = vadd.f32 %v1082_v19, %v510_v20 }
 0x12b   : > { %v1169_v22 = vpop.f32.mrf.mxu0 }
 0x12c   : > { %v516_v23 = vmul.f32 0.01, %v511_v21 }
 0x12d   : > { %v513_v24 = vpop.f32.mrf.mxu0 }
 0x12e   : > { %v517_v25 = vmax.f32 %v511_v21, %v516_v23 }
 0x12f   : > { %v1170_v26 = vpop.f32.mrf.mxu0 }
 0x130   : > { %v518_v27 = vpack.c.bf16 %v517_v25, %v517_v25 }
 0x132   : > { %1188 = vmatmul.mubr.bf16.vlgmr.msra.gmra.mxu1 %v518_v27 }
 0x133   : > { %1227 = vmatprep.mubr.msk.bf16.mxu1 %vm1516_vm0, %v1515_v0  ;;  %1212 = vmatpush3.bf16.msra.mxu1 %v1343_v30 }
 0x134   : > { %1213 = vmatprep.subr.bf16.mxu1 %v1515_v0 }
 0x137   : > { %1214 = vmatpush3.bf16.msra.mxu1 %v1344_v31 }
 0x138   : > { %1215 = vmatprep.subr.bf16.mxu1 %v1515_v0 }
 0x13b   : > { %1216 = vmatpush3.bf16.msra.mxu1 %v1345_v32 }
 0x13c   : > { %1217 = vmatprep.subr.bf16.mxu1 %v1515_v0 }
 0x13f   : > { %1218 = vmatpush3.bf16.msra.mxu1 %v1346_v33 }
 0x140   : > { %1219 = vmatprep.subr.bf16.mxu1 %v1515_v0 }
 0x143   : > { %1220 = vmatpush3.bf16.msra.mxu1 %v1347_v34 }
 0x144   : > { %1221 = vmatprep.subr.bf16.mxu1 %v1515_v0 }
 0x147   : > { %1222 = vmatpush3.bf16.msra.mxu1 %v1348_v35 }
 0x148   : > { %1223 = vmatprep.subr.bf16.mxu1 %v1515_v0 }
 0x14b   : > { %1224 = vmatpush3.bf16.msra.mxu1 %v1349_v45 }
 0x14c   : > { %1225 = vmatprep.subr.bf16.mxu1 %v1515_v0 }
 0x14f   : > { %1226 = vmatpush3.bf16.msra.mxu1 %v1350_v46 }
 0x1f2   : > { %v624_v37 = vpop.f32.mrf.mxu1 }
 0x1f3   : > { %v625_v38 = vadd.f32 %v1086_v36, %v624_v37 }
 0x1f4   : > { %v1189_v39 = vpop.f32.mrf.mxu1 }
 0x1f5   : > { %v630_v40 = vmul.f32 0.01, %v625_v38 }
 0x1f6   : > { %v627_v41 = vpop.f32.mrf.mxu1 }
 0x1f7   : > { %v631_v42 = vmax.f32 %v625_v38, %v630_v40 }
 0x1f8   : > { %v1190_v43 = vpop.f32.mrf.mxu1 }
 0x1f9   : > { %v632_v44 = vpack.c.bf16 %v631_v42, %v631_v42 }
 0x1fb   : > { %1208 = vmatmul.mubr.bf16.vlgmr.msra.gmra.mxu0 %v632_v44 }
 0x1fc   : > { %1247 = vmatprep.mubr.msk.bf16.mxu0 %vm1516_vm0, %v1515_v0  ;;  %1232 = vmatpush3.bf16.msra.mxu0 %v1351_v47 }
 0x1fd   : > { %1233 = vmatprep.subr.bf16.mxu0 %v1515_v0 }
 0x200   : > { %1234 = vmatpush3.bf16.msra.mxu0 %v1352_v48 }
 0x201   : > { %1235 = vmatprep.subr.bf16.mxu0 %v1515_v0 }
 0x204   : > { %1236 = vmatpush3.bf16.msra.mxu0 %v1353_v49 }
 0x205   : > { %1237 = vmatprep.subr.bf16.mxu0 %v1515_v0 }
 0x208   : > { %1238 = vmatpush3.bf16.msra.mxu0 %v1354_v50 }
 0x209   : > { %1239 = vmatprep.subr.bf16.mxu0 %v1515_v0 }
 0x20c   : > { %1240 = vmatpush3.bf16.msra.mxu0 %v1355_v51 }
 0x20d   : > { %1241 = vmatprep.subr.bf16.mxu0 %v1515_v0 }
 0x210   : > { %1242 = vmatpush3.bf16.msra.mxu0 %v1356_v52 }
 0x211   : > { %1243 = vmatprep.subr.bf16.mxu0 %v1515_v0 }
 0x214   : > { %1244 = vmatpush3.bf16.msra.mxu0 %v1357_v62 }
 0x215   : > { %1245 = vmatprep.subr.bf16.mxu0 %v1515_v0  ;;  %v1113_v0 = vld [vmem:[%s1834_s10] ss:$0 sm:$0xff] }
 0x218   : > { %1246 = vmatpush3.bf16.msra.mxu0 %v1358_v63 }
 0x2bb   : > { %v738_v54 = vpop.f32.mrf.mxu0 }
 0x2bc   : > { %v739_v55 = vadd.f32 %v1095_v53, %v738_v54 }
 0x2bd   : > { %v1209_v56 = vpop.f32.mrf.mxu0 }
 0x2be   : > { %v744_v57 = vmul.f32 0.01, %v739_v55 }
 0x2bf   : > { %v741_v58 = vpop.f32.mrf.mxu0 }
 0x2c0   : > { %v745_v59 = vmax.f32 %v739_v55, %v744_v57 }
 0x2c1   : > { %v1210_v60 = vpop.f32.mrf.mxu0 }
 0x2c2   : > { %v746_v61 = vpack.c.bf16 %v745_v59, %v745_v59 }
 0x2c4   : > { %1228 = vmatmul.mubr.bf16.vlgmr.msra.gmra.mxu1 %v746_v61 }
 0x384   : > { %v852_v2 = vpop.f32.mrf.mxu1 }
 0x385   : > { %v853_v3 = vadd.f32 %v1104_v1, %v852_v2 }
 0x386   : > { %v1229_v4 = vpop.f32.mrf.mxu1 }
 0x387   : > { %v858_v5 = vmul.f32 0.01, %v853_v3 }
 0x388   : > { %v855_v6 = vpop.f32.mrf.mxu1 }
 0x389   : > { %v859_v7 = vmax.f32 %v853_v3, %v858_v5 }
 0x38a   : > { %v1230_v8 = vpop.f32.mrf.mxu1 }
 0x38b   : > { %v860_v9 = vpack.c.bf16 %v859_v7, %v859_v7 }
 0x38d   : > { %1248 = vmatmul.mubr.bf16.vlgmr.msra.gmra.mxu0 %v860_v9 }
 0x44d   : > { %v966_v10 = vpop.f32.mrf.mxu0 }
 0x44e   : > { %v967_v11 = vadd.f32 %v1113_v0, %v966_v10 }
 0x44f   : > { %v1249_v12 = vpop.f32.mrf.mxu0 }
 0x450   : > { %973 = vst.msk [vmem:[%s445_s20] sm:$0xff] %vm972_vm2, %v967_v11 }
 0x451   : > { %v969_v13 = vpop.f32.mrf.mxu0 }
 0x453   : > { %v1250_v14 = vpop.f32.mrf.mxu0 }
 0x454 PF: > { %p23_p4 = scmp.ge.s32.totalorder %s1647_s28, 4   ;;  %s1853_s17 = smov %s1499_s18 }
 0x455   : > { %s1854_s18 = smov %s1503_s19  ;;  %s1855_s19 = smov %s1657_s26 }
 0x456   : > { %s1856_s20 = smov %s1647_s28  ;;  %25 = sbr.rel (!%p23_p4) target bundleno = 8 (0x8), region = 116 }
 0x45b   :  { %993 = vsyncpa [#allocation3], 1 }
 0x45c   :  { %995 = vsyncpa [#allocation3 + $0x1], 1 }
 0x45d   :  { %996 = vsyncpa [#allocation5], 1 }
 0x45e   :  { %997 = vsyncpa [#allocation8], 1 }

</bundles_post_ra>
